<compile_context>
chip_gen: v5e
topology: v5e:2x2
jax: 0.10.0
libtpu: 0.0.40
codegen_flags: <defaults>
</compile_context>

<pallas_src>
import functools

import jax
import jax.numpy as jnp
from jax.experimental import pallas as pl
from jax.experimental.pallas import tpu as pltpu


MAX_BLOCK_B = 8192                    # hard cap on rows per grid step
TARGET_STEP_VMEM = 20 * (1 << 20)     # aim ~20 MiB/step -> ~40 MiB with margin
VMEM_LIMIT_CAP = 48 * (1 << 20)       # never ask for more than 48 MiB scoped VMEM
VMEM_RAISE_TRIGGER = 10 * (1 << 20)   # raise scoped limit above this estimate (v5e-safe)


def _cdiv(a, b):
    return -(-a // b)


def _round_up(x, m):
    return ((x + m - 1) // m) * m


def _sublane_multiple(dtype):
    itemsize = jnp.dtype(dtype).itemsize
    if itemsize >= 4:
        return 8
    if itemsize == 2:
        return 16
    return 32


def decoder_kernel(z_ref, w1_ref, b1_ref, w2_ref, b2_ref, w3_ref, b3_ref, out_ref):
    # Fully fused hot path: 3 matmuls + ReLU/ReLU/Sigmoid; intermediates never
    # touch HBM.  MXU inputs stay in the weights' native dtype (bf16 or f32);
    # accumulation and elementwise math are f32.
    f32 = jnp.float32
    z = z_ref[...]

    h = jnp.dot(z, w1_ref[...], preferred_element_type=f32)
    h = jnp.maximum(h + b1_ref[...].astype(f32), 0.0)            # ReLU

    h = jnp.dot(h.astype(w2_ref.dtype), w2_ref[...], preferred_element_type=f32)
    h = jnp.maximum(h + b2_ref[...].astype(f32), 0.0)            # ReLU

    h = jnp.dot(h.astype(w3_ref.dtype), w3_ref[...], preferred_element_type=f32)
    out_ref[...] = jax.nn.sigmoid(h + b3_ref[...].astype(f32)).astype(out_ref.dtype)


def _choose_block_b(B, io_itemsize, latent, h1, h2, out_size, requested):
    """Dtype-aligned batch tile: big enough to amortize per-step overhead,
    small enough for the v7x 64 MiB VMEM, and split so the grid has >= 2
    parallel steps whenever the batch allows it (v7x megacore + DMA overlap)."""
    mult = 8 if io_itemsize >= 4 else (16 if io_itemsize == 2 else 32)
    B_pad = _round_up(B, mult)

    # Per-row VMEM footprint: double-buffered z/out tiles + f32 intermediates.
    per_row = 2 * (latent + out_size) * io_itemsize + (h1 + h2 + out_size) * 4
    vmem_cap_rows = max(mult, (TARGET_STEP_VMEM // per_row) // mult * mult)

    if requested is not None:
        blk = max(mult, _round_up(requested, mult))
    else:
        blk = MAX_BLOCK_B
    blk = min(blk, vmem_cap_rows, B_pad)
    blk = max(blk, mult)

    # Guarantee >= 2 grid steps when possible (only when the caller did not
    # pin an explicit tile size).
    if requested is None and B_pad >= 2 * mult and blk >= B_pad:
        blk = _round_up(_cdiv(B_pad, 2), mult)
    return blk


@functools.partial(jax.jit, static_argnames=("block_b",))
def decoder_forward(z, params, *, block_b=None):
    """z: (B, latent) -> (B, out_size).  Output dtype follows z.dtype."""
    w1, b1, w2, b2, w3, b3 = params
    B, latent = z.shape
    h1, h2, out_size = w1.shape[1], w2.shape[1], w3.shape[1]
    io_bytes = jnp.dtype(z.dtype).itemsize

    blk = _choose_block_b(B, io_bytes, latent, h1, h2, out_size, block_b)
    grid = (_cdiv(B, blk),)

    # --- VMEM budget / scoped-limit sizing -------------------------------
    per_step = blk * (
        2 * (latent + out_size) * io_bytes          # double-buffered z / out tiles
        + (h1 + h2 + out_size) * 4                  # fused f32 intermediates
    )
    weight_bytes = 2 * sum(int(p.size) * p.dtype.itemsize for p in params)
    vmem_est = per_step + weight_bytes
    vmem_limit = None
    if vmem_est > VMEM_RAISE_TRIGGER:
        vmem_limit = min(int(vmem_est * 2), VMEM_LIMIT_CAP)

    # --- Advisory cost estimate for the XLA scheduler --------------------
    cost = pl.CostEstimate(
        flops=2 * B * (latent * h1 + h1 * h2 + h2 * out_size),
        transcendentals=B * out_size,  # sigmoid exp
        bytes_accessed=int(B * (latent + out_size) * io_bytes + weight_bytes // 2),
    )

    # Weights/biases are tiny: full-tensor blocks, constant index_map (resident).
    def rep2(arr):
        r, c = arr.shape
        return pl.BlockSpec((r, c), lambda i: (0, 0))

    return pl.pallas_call(
        decoder_kernel,
        out_shape=jax.ShapeDtypeStruct((B, out_size), z.dtype),
        grid_spec=pltpu.PrefetchScalarGridSpec(
            num_scalar_prefetch=0,
            grid=grid,
            in_specs=[
                pl.BlockSpec((blk, latent), lambda i: (i, 0)),   # z tile
                rep2(w1), rep2(b1),
                rep2(w2), rep2(b2),
                rep2(w3), rep2(b3),
            ],
            out_specs=pl.BlockSpec((blk, out_size), lambda i: (i, 0)),
        ),
        compiler_params=pltpu.CompilerParams(
            dimension_semantics=("parallel",),
            vmem_limit_bytes=vmem_limit,
        ),
        cost_estimate=cost,
    )(z, w1, b1, w2, b2, w3, b3)


def init_decoder_params(key, latent_size, out_size, dtype=jnp.float32):
    """Deterministic init mimicking nn.Linear's uniform(-1/sqrt(fan_in), +...)."""
    h1 = out_size // 4
    h2 = out_size // 2
    dims = [(latent_size, h1), (h1, h2), (h2, out_size)]
    params = []
    for fan_in, fan_out in dims:
        key, kw, kb = jax.random.split(key, 3)
        bound = 1.0 / jnp.sqrt(float(fan_in))
        w = jax.random.uniform(kw, (fan_in, fan_out), jnp.float32, -bound, bound)
        b = jax.random.uniform(kb, (1, fan_out), jnp.float32, -bound, bound)
        params += [w.astype(dtype), b.astype(dtype)]
    return tuple(params)


def decoder_reference(z, params):
    w1, b1, w2, b2, w3, b3 = (p.astype(jnp.float32) for p in params)
    z = z.astype(jnp.float32)
    h = jnp.maximum(z @ w1 + b1, 0.0)
    h = jnp.maximum(h @ w2 + b2, 0.0)
    return jax.nn.sigmoid(h @ w3 + b3)


if __name__ == "__main__":
    key = jax.random.PRNGKey(0)
    latent_size, out_size = 32, 128  # hidden sizes: 32 -> 64 -> 128
    k_in, k_p = jax.random.split(key)

    # --- 1) f32 check: small batch, auto-split into a 2-step parallel grid --
    batch = 64
    z = jax.random.normal(k_in, (batch, latent_size), jnp.float32)
    params = init_decoder_params(k_p, latent_size, out_size, jnp.float32)

    out = jax.block_until_ready(decoder_forward(z, params))
    ref = decoder_reference(z, params)
    assert out.shape == (batch, out_size)
    # Tolerance accounts for possible MXU multi-pass f32 vs XLA dot differences.
    assert jnp.max(jnp.abs(out - ref)) < 2e-3

    # --- 2) bf16 I/O: multi-step pipelined grid, ragged batch (masked tail) --
    big_batch = 1000
    zb = jax.random.normal(k_in, (big_batch, latent_size), jnp.float32)
    params_bf16 = tuple(p.astype(jnp.bfloat16) for p in params)

    out_bf = jax.block_until_ready(
        decoder_forward(zb.astype(jnp.bfloat16), params_bf16)
    )
    ref_bf = decoder_reference(zb, params)
    assert out_bf.shape == (big_batch, out_size)
    assert out_bf.dtype == jnp.bfloat16  # bf16 input -> bf16 output (documented)
    assert jnp.max(jnp.abs(out_bf.astype(jnp.float32) - ref_bf)) < 5e-2

    print("KERNEL_OK")
</pallas_src>

<mosaic_0001>
module attributes {stable_mosaic.version = 11 : i64} {
  func.func @decoder_kernel(%arg0: i32, %arg1: memref<32x32xf32, #tpu.memory_space<vmem>>, %arg2: memref<32x32xf32, #tpu.memory_space<vmem>>, %arg3: memref<1x32xf32, #tpu.memory_space<vmem>>, %arg4: memref<32x64xf32, #tpu.memory_space<vmem>>, %arg5: memref<1x64xf32, #tpu.memory_space<vmem>>, %arg6: memref<64x128xf32, #tpu.memory_space<vmem>>, %arg7: memref<1x128xf32, #tpu.memory_space<vmem>>, %arg8: memref<32x128xf32, #tpu.memory_space<vmem>>) attributes {dimension_semantics = [#tpu.dimension_semantics<parallel>], iteration_bounds = array<i64: 2>, scalar_prefetch = 0 : i64, scratch_operands = 0 : i64, tpu.core_type = #tpu.core_type<tc>, window_params = [{transform_indices = @transform_0, window_bounds = array<i64: 32, 32>}, {pipeline_mode = #tpu.pipeline_mode<synchronous>, transform_indices = @transform_1, window_bounds = array<i64: 32, 32>}, {pipeline_mode = #tpu.pipeline_mode<synchronous>, transform_indices = @transform_2, window_bounds = array<i64: 1, 32>}, {pipeline_mode = #tpu.pipeline_mode<synchronous>, transform_indices = @transform_3, window_bounds = array<i64: 32, 64>}, {pipeline_mode = #tpu.pipeline_mode<synchronous>, transform_indices = @transform_4, window_bounds = array<i64: 1, 64>}, {pipeline_mode = #tpu.pipeline_mode<synchronous>, transform_indices = @transform_5, window_bounds = array<i64: 64, 128>}, {pipeline_mode = #tpu.pipeline_mode<synchronous>, transform_indices = @transform_6, window_bounds = array<i64: 1, 128>}, {transform_indices = @transform_7, window_bounds = array<i64: 32, 128>}]} {
    %c0 = arith.constant 0 : index
    %c0_0 = arith.constant 0 : index
    %0 = vector.load %arg1[%c0, %c0_0] : memref<32x32xf32, #tpu.memory_space<vmem>>, vector<32x32xf32>
    %c0_1 = arith.constant 0 : index
    %c0_2 = arith.constant 0 : index
    %1 = vector.load %arg2[%c0_1, %c0_2] : memref<32x32xf32, #tpu.memory_space<vmem>>, vector<32x32xf32>
    %cst = arith.constant dense<0.000000e+00> : vector<32x32xf32>
    %2 = tpu.matmul %0, %1, %cst {dimension_numbers = #tpu.dot_dimension_numbers<[1], [0], [0], [1], [0, 0, 1, 1], [], []>} : vector<32x32xf32>, vector<32x32xf32>, vector<32x32xf32> -> vector<32x32xf32>
    %c0_3 = arith.constant 0 : index
    %c0_4 = arith.constant 0 : index
    %3 = vector.load %arg3[%c0_3, %c0_4] : memref<1x32xf32, #tpu.memory_space<vmem>>, vector<1x32xf32>
    %4 = vector.broadcast %3 : vector<1x32xf32> to vector<32x32xf32>
    %5 = arith.addf %2, %4 : vector<32x32xf32>
    %cst_5 = arith.constant 0.000000e+00 : f32
    %6 = vector.broadcast %cst_5 : f32 to vector<32x32xf32>
    %7 = arith.maximumf %5, %6 : vector<32x32xf32>
    %c0_6 = arith.constant 0 : index
    %c0_7 = arith.constant 0 : index
    %8 = vector.load %arg4[%c0_6, %c0_7] : memref<32x64xf32, #tpu.memory_space<vmem>>, vector<32x64xf32>
    %cst_8 = arith.constant dense<0.000000e+00> : vector<32x64xf32>
    %9 = tpu.matmul %7, %8, %cst_8 {dimension_numbers = #tpu.dot_dimension_numbers<[1], [0], [0], [1], [0, 0, 1, 1], [], []>} : vector<32x32xf32>, vector<32x64xf32>, vector<32x64xf32> -> vector<32x64xf32>
    %c0_9 = arith.constant 0 : index
    %c0_10 = arith.constant 0 : index
    %10 = vector.load %arg5[%c0_9, %c0_10] : memref<1x64xf32, #tpu.memory_space<vmem>>, vector<1x64xf32>
    %11 = vector.broadcast %10 : vector<1x64xf32> to vector<32x64xf32>
    %12 = arith.addf %9, %11 : vector<32x64xf32>
    %cst_11 = arith.constant 0.000000e+00 : f32
    %13 = vector.broadcast %cst_11 : f32 to vector<32x64xf32>
    %14 = arith.maximumf %12, %13 : vector<32x64xf32>
    %c0_12 = arith.constant 0 : index
    %c0_13 = arith.constant 0 : index
    %15 = vector.load %arg6[%c0_12, %c0_13] : memref<64x128xf32, #tpu.memory_space<vmem>>, vector<64x128xf32>
    %cst_14 = arith.constant dense<0.000000e+00> : vector<32x128xf32>
    %16 = tpu.matmul %14, %15, %cst_14 {dimension_numbers = #tpu.dot_dimension_numbers<[1], [0], [0], [1], [0, 0, 1, 1], [], []>} : vector<32x64xf32>, vector<64x128xf32>, vector<32x128xf32> -> vector<32x128xf32>
    %c0_15 = arith.constant 0 : index
    %c0_16 = arith.constant 0 : index
    %17 = vector.load %arg7[%c0_15, %c0_16] : memref<1x128xf32, #tpu.memory_space<vmem>>, vector<1x128xf32>
    %18 = vector.broadcast %17 : vector<1x128xf32> to vector<32x128xf32>
    %19 = arith.addf %16, %18 : vector<32x128xf32>
    %20 = arith.negf %19 : vector<32x128xf32>
    %21 = math.exp %20 : vector<32x128xf32>
    %cst_17 = arith.constant 1.000000e+00 : f32
    %22 = vector.broadcast %cst_17 : f32 to vector<32x128xf32>
    %23 = arith.addf %22, %21 : vector<32x128xf32>
    %24 = arith.divf %22, %23 : vector<32x128xf32>
    %c0_18 = arith.constant 0 : index
    %c0_19 = arith.constant 0 : index
    %25 = vector.load %arg8[%c0_18, %c0_19] : memref<32x128xf32, #tpu.memory_space<vmem>>, vector<32x128xf32>
    tpu.vector_store %arg8[%c0_18, %c0_19], %24 {strides = array<i32>} : memref<32x128xf32, #tpu.memory_space<vmem>>, vector<32x128xf32>,
    return
  }
  func.func @transform_0(%arg0: i32) -> (i32, i32) {
    %c0_i32 = arith.constant 0 : i32
    %c0_i32_0 = arith.constant 0 : i32
    return %arg0, %c0_i32 : i32, i32
  }
  func.func @transform_1(%arg0: i32) -> (i32, i32) {
    %c0_i32 = arith.constant 0 : i32
    %c0_i32_0 = arith.constant 0 : i32
    %c0_i32_1 = arith.constant 0 : i32
    return %c0_i32, %c0_i32_0 : i32, i32
  }
  func.func @transform_2(%arg0: i32) -> (i32, i32) {
    %c0_i32 = arith.constant 0 : i32
    %c0_i32_0 = arith.constant 0 : i32
    %c0_i32_1 = arith.constant 0 : i32
    return %c0_i32, %c0_i32_0 : i32, i32
  }
  func.func @transform_3(%arg0: i32) -> (i32, i32) {
    %c0_i32 = arith.constant 0 : i32
    %c0_i32_0 = arith.constant 0 : i32
    %c0_i32_1 = arith.constant 0 : i32
    return %c0_i32, %c0_i32_0 : i32, i32
  }
  func.func @transform_4(%arg0: i32) -> (i32, i32) {
    %c0_i32 = arith.constant 0 : i32
    %c0_i32_0 = arith.constant 0 : i32
    %c0_i32_1 = arith.constant 0 : i32
    return %c0_i32, %c0_i32_0 : i32, i32
  }
  func.func @transform_5(%arg0: i32) -> (i32, i32) {
    %c0_i32 = arith.constant 0 : i32
    %c0_i32_0 = arith.constant 0 : i32
    %c0_i32_1 = arith.constant 0 : i32
    return %c0_i32, %c0_i32_0 : i32, i32
  }
  func.func @transform_6(%arg0: i32) -> (i32, i32) {
    %c0_i32 = arith.constant 0 : i32
    %c0_i32_0 = arith.constant 0 : i32
    %c0_i32_1 = arith.constant 0 : i32
    return %c0_i32, %c0_i32_0 : i32, i32
  }
  func.func @transform_7(%arg0: i32) -> (i32, i32) {
    %c0_i32 = arith.constant 0 : i32
    %c0_i32_0 = arith.constant 0 : i32
    return %arg0, %c0_i32 : i32, i32
  }
}

</mosaic_0001>

<bundles_post_ra>
// kernel: decoder_forward.1
= control target key start
LH: loop header
LB: loop body
LE: loop exit
PB: predicated region body
PF: predicated region fallthrough
CT: control target
= control target key end

     0   :  { %12 = vsyncpa [#allocation3], 0  ;;  %s1045_s0 = inlined_call_operand.vmem [shape: f32[64,32], index: 0, kind: input, shape index: {}]   ;;  %s1046_s1 = inlined_call_operand.vmem [shape: f32[32,32], index: 1, kind: input, shape index: {}]   ;;  %s1047_s2 = inlined_call_operand.vmem [shape: f32[1,32], index: 2, kind: input, shape index: {}]   ;;  %s1048_s3 = inlined_call_operand.hbm [shape: f32[32,64], index: 3, kind: input, shape index: {}]   ;;  %s1049_s4 = inlined_call_operand.vmem [shape: f32[1,64], index: 4, kind: input, shape index: {}]   ;;  %s1050_s5 = inlined_call_operand.vmem [shape: f32[64,128], index: 5, kind: input, shape index: {}]   ;;  %s1051_s6 = inlined_call_operand.vmem [shape: f32[1,128], index: 6, kind: input, shape index: {}]   ;;  %s1052_s7 = inlined_call_operand.hbm [shape: f32[64,128], index: 7, kind: output, shape index: {}]  }
   0x1   :  { %13 = vsyncpa [#allocation4], 0 }
   0x2   :  { %15 = vsyncpa [#allocation4 + $0x1], 0  ;;  %s887_s24 = smov 0   ;;  %s889_s25 = smov 0  }
   0x3   :  { %s891_s26 = smov 0   ;;  %s893_s27 = smov 0  }
   0x4 LB: > { %s908_s28 = sadd.s32 4294967295, %s840_s27   ;;  %s632_s29 = sadd.s32 4294967294, %s840_s27   ;;  %s840_s27 = sphi %s893_s27, %s1058_s27   ;;  %s836_s26 = sphi %s891_s26, %s1057_s26   ;;  %s832_s25 = sphi %s889_s25, %s1056_s25   ;;  %s828_s24 = sphi %s887_s24, %s1055_s24  }
   0x5   : > { %s912_s30 = sadd.s32 1, %s840_s27   ;;  %s180_s8 = sadd.s32 1, %s836_s26 }
   0x6   : > { %s177_s9 = ssub.s32 %s840_s27, %s912_s30  ;;  %p190_p0 = scmp.ne.s32.totalorder %s836_s26, %s832_s25 }
   0x7   : > { %p178_p1 = scmp.eq.s32.totalorder %s177_s9, 0  ;;  %p191_p2 = scmp.eq.s32.totalorder %s908_s28, 1 }
   0x8   : > { %p196_p3 = scmp.ne.s32.totalorder %s832_s25, %s828_s24  ;;  %p197_p4 = scmp.eq.s32.totalorder %s632_s29, 1 }
   0x9   : > { %s923_s10 = scalar_select %p178_p1, %s836_s26, %s180_s8  }
   0xa   : > { %p925_p5 = por %p191_p2, %p190_p0  ;;  %p929_p6 = por %p197_p4, %p196_p3 }
   0xb   : > { %p633_p7 = scmp.ge.s32.totalorder %s840_s27, 1  ;;  %p204_p8 = scmp.lt.s32.totalorder %s840_s27, 3 }
   0xc   : > { %p685_p9 = scmp.eq.s32.totalorder %s908_s28, 0  ;;  %s221_s15 = sshll.u32 %s1048_s3, 4  ;;  %s222_s15 = int_to_ptr.hbm [resolvable:$true] %s221_s15 }
   0xd   : > { %p205_p10 = pnand %p633_p7, %p204_p8  ;;  %s842_s16 = smov [#allocation2]  }
   0xe   : > { %s223_s17 = sshll.u32 %s842_s16, 4  ;;  %s843_s18 = smov 128   ;;  %s224_s17 = int_to_ptr.vmem [resolvable:$true] %s223_s17 }
   0xf   : > { %p677_p11 = pneg %p205_p10  ;;  %s844_s19 = smov 8  }
  0x10   : > { %257 = sbr.rel (%p205_p10) target bundleno = 480 (0x1e0), region = 48 }
  0x11   : > { %p678_p12 = pnand %p685_p9, %p677_p11 }
  0x13   : > { %680 = dma.hbm_to_vmem [thread:$0]  (!%p678_p12), %s222_s15, 512, %s224_s17, [#allocation3], %s843_s18, %s843_s18, %s844_s19  }
  0x15   : > { %819 = dma.done.wait (%p685_p9), [#allocation3], 512  }
  0x16   : > { %821 = vsyncadd (%p685_p9), [#allocation3], 4294966784  ;;  %s639_s20 = sshll.u32 %s908_s28, 2  ;;  %v304_v0 = vld [vmem:[%s1046_s1 + $0x18] sm:$0xff]  ;;  %v303_v1 = vld [vmem:[%s1046_s1 + $0x10] sm:$0xff]  ;;  %vm309_vm0 = vcmask 261120  }
  0x17   : > { %p291_p13 = scmp.lt.s32.totalorder %s639_s20, 7  ;;  %334 = vmatpush.msra.mxu0 %v304_v0  ;;  %v302_v2 = vld [vmem:[%s1046_s1 + $0x8] sm:$0xff]  ;;  %v358_v3 = vld [vmem:[#allocation2 + $0x18] sm:$0xff]  ;;  %v301_v4 = vld [vmem:[%s1046_s1] sm:$0xff]  ;;  %vm420_vm1 = vcmask 523264   ;;  %s287_s13 = sand.u32 1, %s832_s25  }
  0x18   : > { %387 = vmatpush.msra.mxu1 %v358_v3  ;;  %v357_v9 = vld [vmem:[#allocation2 + $0x10] sm:$0xff]  ;;  %v356_v10 = vld [vmem:[#allocation2 + $0x8] sm:$0xff]  ;;  %v355_v11 = vld [vmem:[#allocation2] sm:$0xff]  ;;  %s638_s14 = sshll.u32 %s287_s13, 5  ;;  %s794_s9 = scalar_lea.hbm %s1052_s7, 64 }
  0x19   : > { %s1060_s20 = smov (!%p291_p13, %s639_s20), 7  ;;  %335 = vmatpush.msra.mxu0 %v303_v1  ;;  %v725_v12 = vld [vmem:[%s1047_s2] ss:$0 sm:$0xff]  ;;  %v415_v13 = vld [vmem:[%s1050_s5 + $0x38] sm:$0xff]  ;;  %v414_v14 = vld [vmem:[%s1050_s5 + $0x30] sm:$0xff]  ;;  %s1005_s15 = scalar_lea.vmem [#allocation5], %s638_s14 }
  0x1a   : > { %s640_s21 = sshll.u32 %s1060_s20, 3  ;;  %388 = vmatpush.msra.mxu1 %v357_v9  ;;  %441 = vmatpush.msra.mxu2 %v415_v13  ;;  %v413_v15 = vld [vmem:[%s1050_s5 + $0x28] sm:$0xff]  ;;  %v412_v18 = vld [vmem:[%s1050_s5 + $0x20] sm:$0xff]  ;;  %v411_v20 = vld [vmem:[%s1050_s5 + $0x18] sm:$0xff] }
  0x1b   : > { %s294_s16 = scalar_lea.vmem %s1045_s0, %s640_s21  ;;  %336 = vmatpush.msra.mxu0 %v302_v2  ;;  %663 = vmatpush.msra.mxu3 %v415_v13  ;;  %v410_v30 = vld [vmem:[%s1050_s5 + $0x10] sm:$0xff]  ;;  %v409_v31 = vld [vmem:[%s1050_s5 + $0x8] sm:$0xff]  ;;  %v408_v32 = vld [vmem:[%s1050_s5] sm:$0xff]  ;;  %s543_s21 = scalar_lea.sflag [#allocation4], %s287_s13 }
  0x1c   : > { %v297_v5 = vld [vmem:[%s294_s16] sm:$0xff]  ;;  %v298_v6 = vld [vmem:[%s294_s16 + $0x8] sm:$0xff]  ;;  %v299_v7 = vld [vmem:[%s294_s16 + $0x10] sm:$0xff]  ;;  %389 = vmatpush.msra.mxu1 %v356_v10  ;;  %442 = vmatpush.msra.mxu2 %v414_v14 }
  0x1d   : > { %337 = vmatpush.msra.mxu0 %v301_v4  ;;  %v300_v8 = vld [vmem:[%s294_s16 + $0x18] sm:$0xff]  ;;  %664 = vmatpush.msra.mxu3 %v414_v14  ;;  %v726_v33 = vld [vmem:[%s1049_s4] ss:$0 sm:$0xff]  ;;  %s662_s16 = sshll.u32 %s908_s28, 5  ;;  %s555_s28 = sshll.u32 %s1005_s15, 4  ;;  %s556_s28 = int_to_ptr.vmem [resolvable:$true] %s555_s28 }
  0x1e   : > { %641 = vmatmul.msk.f32.vlgmr.msra.gmra.mxu0 %vm309_vm0, %v297_v5  ;;  %390 = vmatpush.msra.mxu1 %v355_v11  ;;  %v727_v46 = vld [vmem:[%s1051_s6] ss:$0 sm:$0xff]  ;;  %s554_s19 = scalar_lea.hbm %s1052_s7, %s662_s16 }
  0x1f   : > { %443 = vmatpush.msra.mxu2 %v413_v15  ;;  %665 = vmatpush.msra.mxu3 %v413_v15  ;;  %s557_s20 = sshll.u32 %s554_s19, 4  ;;  %s558_s20 = int_to_ptr.hbm [resolvable:$true] %s557_s20 }
  0x20   : > { %s788_s22 = sshra.s32 %s558_s20, 4  ;;  %s789_s22 = int_to_ptr.hbm [resolvable:$true] %s788_s22 }
  0x21   : > { %444 = vmatpush.msra.mxu2 %v412_v18  ;;  %666 = vmatpush.msra.mxu3 %v412_v18  ;;  %s790_s23 = scalar_lea.hbm %s789_s22, 32  ;;  %p795_p3 = scmp.lt.s32.totalorder %s789_s22, %s1052_s7 }
  0x22   : > { %p791_p0 = scmp.ne.s32.totalorder %s789_s22, %s790_s23  ;;  %p796_p4 = scmp.lt.s32.totalorder %s794_s9, %s790_s23 }
  0x23   : > { %445 = vmatpush.msra.mxu2 %v411_v20  ;;  %667 = vmatpush.msra.mxu3 %v411_v20 }
  0x24   : > { %p792_p1 = pnand %p791_p0, %p925_p5  ;;  %p797_p7 = por %p796_p4, %p795_p3 }
  0x25   : > { %446 = vmatpush.msra.mxu2 %v410_v30  ;;  %668 = vmatpush.msra.mxu3 %v410_v30 }
  0x26   : > { %642 = vmatmul.msk.f32.gmra.mxu0 %vm309_vm0, %v298_v6  ;;  %p793_p2 = pneg %p792_p1 }
  0x27   : > { %447 = vmatpush.msra.mxu2 %v409_v31  ;;  %669 = vmatpush.msra.mxu3 %v409_v31 }
  0x28   : > { %p798_p8 = pnand %p797_p7, %p793_p2 }
  0x29   : > { %448 = vmatpush.msra.mxu2 %v408_v32  ;;  %670 = vmatpush.msra.mxu3 %v408_v32 }
  0x2e   : > { %643 = vmatmul.msk.f32.gmra.mxu0 %vm309_vm0, %v299_v7 }
  0x36   : > { %644 = vmatmul.msk.f32.gmra.mxu0 %vm309_vm0, %v300_v8 }
  0x9b   : > { %v339_v16 = vpop.f32.mrf.mxu0 }
  0x9c   : > { %v340_v17 = vadd.f32 %v725_v12, %v339_v16 }
  0x9e   : > { %v351_v19 = vmax.f32 %v340_v17, 0.0 }
  0xa0   : > { %645 = vmatmul.msk.f32.vlgmr.msra.gmra.mxu1 %vm309_vm0, %v351_v19 }
  0xa3   : > { %v342_v21 = vpop.f32.mrf.mxu0 }
  0xa4   : > { %v343_v22 = vadd.f32 %v725_v12, %v342_v21 }
  0xa6   : > { %v352_v23 = vmax.f32 %v343_v22, 0.0 }
  0xa8   : > { %646 = vmatmul.msk.f32.gmra.mxu1 %vm309_vm0, %v352_v23 }
  0xab   : > { %v345_v24 = vpop.f32.mrf.mxu0 }
  0xac   : > { %v346_v25 = vadd.f32 %v725_v12, %v345_v24 }
  0xae   : > { %v353_v26 = vmax.f32 %v346_v25, 0.0 }
  0xb0   : > { %647 = vmatmul.msk.f32.gmra.mxu1 %vm309_vm0, %v353_v26 }
  0xb3   : > { %v348_v27 = vpop.f32.mrf.mxu0 }
  0xb4   : > { %v349_v28 = vadd.f32 %v725_v12, %v348_v27 }
  0xb6   : > { %v354_v29 = vmax.f32 %v349_v28, 0.0 }
  0xb8   : > { %648 = vmatmul.msk.f32.gmra.mxu1 %vm309_vm0, %v354_v29 }
 0x11d   : > { %v392_v34 = vpop.f32.mrf.mxu1 }
 0x11e   : > { %v393_v35 = vadd.f32 %v726_v33, %v392_v34 }
 0x120   : > { %v404_v36 = vmax.f32 %v393_v35, 0.0 }
 0x122   : > { %649 = vmatmul.msk.f32.vlgmr.msra.gmra.mxu2 %vm420_vm1, %v404_v36 }
 0x125   : > { %v395_v37 = vpop.f32.mrf.mxu1 }
 0x126   : > { %v396_v38 = vadd.f32 %v726_v33, %v395_v37 }
 0x128   : > { %v405_v39 = vmax.f32 %v396_v38, 0.0 }
 0x12a   : > { %650 = vmatmul.msk.f32.vlgmr.msra.gmra.mxu3 %vm420_vm1, %v405_v39 }
 0x12d   : > { %v398_v40 = vpop.f32.mrf.mxu1 }
 0x12e   : > { %v399_v41 = vadd.f32 %v726_v33, %v398_v40 }
 0x130   : > { %v406_v42 = vmax.f32 %v399_v41, 0.0 }
 0x132   : > { %651 = vmatmul.msk.f32.gmra.mxu3 %vm420_vm1, %v406_v42 }
 0x135   : > { %v401_v43 = vpop.f32.mrf.mxu1 }
 0x136   : > { %v402_v44 = vadd.f32 %v726_v33, %v401_v43 }
 0x138   : > { %v407_v45 = vmax.f32 %v402_v44, 0.0 }
 0x13a   : > { %652 = vmatmul.msk.f32.gmra.mxu3 %vm420_vm1, %v407_v45 }
 0x1a5   : > { %v450_v47 = vpop.f32.mrf.mxu2 }
 0x1a6   : > { %v451_v48 = vadd.f32 %v727_v46, %v450_v47 }
 0x1a8   : > { %v653_v49 = vmul.f32 -1.442695, %v451_v48 }
 0x1aa   : > { %728 = vpow2.f32 %v653_v49 }
 0x1ad   : > { %v453_v50 = vpop.f32.mrf.mxu3 }
 0x1ae   : > { %v454_v51 = vadd.f32 %v727_v46, %v453_v50 }
 0x1b0   : > { %v729_v52 = vpop.eup %728  ;;  %v654_v53 = vmul.f32 -1.442695, %v454_v51 }
 0x1b1   : > { %v474_v54 = vadd.f32 1.0, %v729_v52 }
 0x1b2   : > { %730 = vpow2.f32 %v654_v53 }
 0x1b3   : > { %732 = vrcp.f32 %v474_v54  ;;  %v489_v63 = vand.u32 2147483648, %v474_v54  ;;  %v487_v2 = vand.u32 2147483647, %v474_v54  ;;  %vm483_vm3 = vweird.f32 %v474_v54 }
 0x1b5   : > { %v456_v55 = vpop.f32.mrf.mxu3  ;;  %v490_v8 = vor.u32 1.1754944e-38, %v489_v63  ;;  %vm488_vm5 = vcmp.eq.f32.partialorder %v487_v2, 8.507059e+37 }
 0x1b6   : > { %v457_v56 = vadd.f32 %v727_v46, %v456_v55 }
 0x1b8   : > { %v731_v57 = vpop.eup %730  ;;  %v655_v58 = vmul.f32 -1.442695, %v457_v56 }
 0x1b9   : > { %v733_v59 = vpop.eup %732  ;;  %v475_v60 = vadd.f32 1.0, %v731_v57 }
 0x1ba   : > { %v479_v61 = vmul.f32 %v733_v59, %v474_v54  ;;  %734 = vpow2.f32 %v655_v58  ;;  %vm484_vm2 = vweird.f32 %v733_v59 }
 0x1bb   : > { %736 = vrcp.f32 %v475_v60  ;;  %vm485_vm4 = vmor %vm483_vm3, %vm484_vm2  ;;  %v504_v14 = vand.u32 2147483648, %v475_v60  ;;  %v502_v16 = vand.u32 2147483647, %v475_v60  ;;  %vm498_vm7 = vweird.f32 %v475_v60 }
 0x1bc   : > { %v480_v62 = vsub.f32 1.0, %v479_v61 }
 0x1bd   : > { %v459_v0 = vpop.f32.mrf.mxu3  ;;  %v505_v20 = vor.u32 1.1754944e-38, %v504_v14  ;;  %vm503_vm9 = vcmp.eq.f32.partialorder %v502_v16, 8.507059e+37 }
 0x1be   : > { %v481_v1 = vmul.f32 %v733_v59, %v480_v62  ;;  %v460_v3 = vadd.f32 %v727_v46, %v459_v0 }
 0x1c0   : > { %v735_v4 = vpop.eup %734  ;;  %v482_v5 = vadd.f32 %v733_v59, %v481_v1  ;;  %v656_v6 = vmul.f32 -1.442695, %v460_v3 }
 0x1c1   : > { %v737_v7 = vpop.eup %736  ;;  %v476_v9 = vadd.f32 1.0, %v735_v4 }
 0x1c2   : > { %v486_v10 = vsel %vm485_vm4, %v733_v59, %v482_v5  ;;  %v494_v11 = vmul.f32 %v737_v7, %v475_v60  ;;  %738 = vpow2.f32 %v656_v6  ;;  %vm499_vm6 = vweird.f32 %v737_v7 }
 0x1c3   : > { %v491_v12 = vsel %vm488_vm5, %v490_v8, %v486_v10  ;;  %740 = vrcp.f32 %v476_v9  ;;  %vm500_vm8 = vmor %vm498_vm7, %vm499_vm6  ;;  %v519_v26 = vand.u32 2147483648, %v476_v9  ;;  %v517_v28 = vand.u32 2147483647, %v476_v9 }
 0x1c4   : > { %538 = vst [vmem:[%s1005_s15] sm:$0xff] %v491_v12  ;;  %v495_v13 = vsub.f32 1.0, %v494_v11  ;;  %vm513_vm11 = vweird.f32 %v476_v9 }
 0x1c5   : > { %v520_v31 = vor.u32 1.1754944e-38, %v519_v26  ;;  %vm518_vm13 = vcmp.eq.f32.partialorder %v517_v28, 8.507059e+37 }
 0x1c6   : > { %v496_v15 = vmul.f32 %v737_v7, %v495_v13 }
 0x1c8   : > { %v739_v17 = vpop.eup %738  ;;  %v497_v18 = vadd.f32 %v737_v7, %v496_v15 }
 0x1c9   : > { %v741_v19 = vpop.eup %740  ;;  %v477_v21 = vadd.f32 1.0, %v739_v17 }
 0x1ca   : > { %v501_v22 = vsel %vm500_vm8, %v737_v7, %v497_v18  ;;  %v509_v23 = vmul.f32 %v741_v19, %v476_v9  ;;  %vm514_vm10 = vweird.f32 %v741_v19 }
 0x1cb   : > { %v506_v24 = vsel %vm503_vm9, %v505_v20, %v501_v22  ;;  %742 = vrcp.f32 %v477_v21  ;;  %vm515_vm12 = vmor %vm513_vm11, %vm514_vm10  ;;  %v534_v36 = vand.u32 2147483648, %v477_v21  ;;  %v532_v38 = vand.u32 2147483647, %v477_v21 }
 0x1cc   : > { %539 = vst [vmem:[%s1005_s15 + $0x8] sm:$0xff] %v506_v24  ;;  %v510_v25 = vsub.f32 1.0, %v509_v23  ;;  %vm528_vm15 = vweird.f32 %v477_v21 }
 0x1cd   : > { %v535_v40 = vor.u32 1.1754944e-38, %v534_v36  ;;  %vm533_vm1 = vcmp.eq.f32.partialorder %v532_v38, 8.507059e+37 }
 0x1ce   : > { %v511_v27 = vmul.f32 %v741_v19, %v510_v25 }
 0x1d0   : > { %v512_v29 = vadd.f32 %v741_v19, %v511_v27 }
 0x1d1   : > { %v743_v30 = vpop.eup %742 }
 0x1d2   : > { %v516_v32 = vsel %vm515_vm12, %v741_v19, %v512_v29  ;;  %v524_v33 = vmul.f32 %v743_v30, %v477_v21  ;;  %vm529_vm14 = vweird.f32 %v743_v30 }
 0x1d3   : > { %v521_v34 = vsel %vm518_vm13, %v520_v31, %v516_v32  ;;  %vm530_vm0 = vmor %vm528_vm15, %vm529_vm14 }
 0x1d4   : > { %540 = vst [vmem:[%s1005_s15 + $0x10] sm:$0xff] %v521_v34  ;;  %v525_v35 = vsub.f32 1.0, %v524_v33 }
 0x1d6   : > { %v526_v37 = vmul.f32 %v743_v30, %v525_v35 }
 0x1d8   : > { %v527_v39 = vadd.f32 %v743_v30, %v526_v37 }
 0x1da   : > { %v531_v41 = vsel %vm530_vm0, %v743_v30, %v527_v39 }
 0x1db   : > { %v536_v42 = vsel %vm533_vm1, %v535_v40, %v531_v41 }
 0x1dc   : > { %541 = vst [vmem:[%s1005_s15 + $0x18] sm:$0xff] %v536_v42 }
 0x1dd   : > { %801 = shalt.err (!%p798_p8)
}
 0x1de   : > { %s845_s13 = smov 128   ;;  %s846_s15 = smov 8  }
 0x1df   : > { %675 = dma.vmem_to_hbm [thread:$0]  (%p925_p5), %s556_s28, 512, %s558_s20, %s543_s21, %s845_s13, %s845_s13, %s846_s15  }
 0x1e0 PF: > { %p687_p9 = scmp.ge.s32.totalorder %s840_s27, 2  ;;  %s572_s17 = sand.u32 1, %s828_s24  }
 0x1e1   : > { %s573_s18 = scalar_lea.sflag [#allocation4], %s572_s17 }
 0x1e2   : > { %p682_p10 = pnand %p687_p9, %p929_p6 }
 0x1e4   : > { %p683_p11 = pneg %p682_p10 }
 0x1e6   : > { %823 = dma.done.wait (%p683_p11), %s573_s18, 512  }
 0x1e7   : > { %825 = vsyncadd (%p683_p11), %s573_s18, 4294966784  ;;  %p18_p12 = scmp.ge.s32.totalorder %s912_s30, 4   ;;  %s1055_s24 = smov %s832_s25 }
 0x1e8   : > { %s1056_s25 = smov %s836_s26  ;;  %s1057_s26 = smov %s923_s10 }
 0x1e9   : > { %s1058_s27 = smov %s912_s30  ;;  %20 = sbr.rel (!%p18_p12) target bundleno = 4 (0x4), region = 88 }
 0x1ee   :  { %579 = vsyncpa [#allocation3], 1 }
 0x1ef   :  { %581 = vsyncpa [#allocation3 + $0x1], 1 }
 0x1f0   :  { %582 = vsyncpa [#allocation4], 1 }
 0x1f1   :  { %584 = vsyncpa [#allocation4 + $0x1], 1 }

</bundles_post_ra>
